<compile_context>
chip_gen: v5e
topology: v5e:2x2
jax: 0.10.0
libtpu: 0.0.40
codegen_flags: <defaults>
</compile_context>

<pallas_src>
import math
import numpy as np

import jax
import jax.numpy as jnp
from jax.experimental import pallas as pl
from jax.experimental.pallas import tpu as pltpu


# ----------------------------------------------------------------------------
# DCT filter construction (deterministic, mirrors the PyTorch buffer exactly)
# ----------------------------------------------------------------------------
def get_freq_indices(method):
    assert method in ['top1', 'top2', 'top4', 'top8', 'top16', 'top32',
                      'bot1', 'bot2', 'bot4', 'bot8', 'bot16', 'bot32',
                      'low1', 'low2', 'low4', 'low8', 'low16', 'low32']
    num_freq = int(method[3:])
    if 'top' in method:
        all_x = [0, 0, 6, 0, 0, 1, 1, 4, 5, 1, 3, 0, 0, 0, 3, 2,
                 4, 6, 3, 5, 5, 2, 6, 5, 5, 3, 3, 4, 2, 2, 6, 1]
        all_y = [0, 1, 0, 5, 2, 0, 2, 0, 0, 6, 0, 4, 6, 3, 5, 2,
                 6, 3, 3, 3, 5, 1, 1, 2, 4, 2, 1, 1, 3, 0, 5, 3]
    elif 'low' in method:
        all_x = [0, 0, 1, 1, 0, 2, 2, 1, 2, 0, 3, 4, 0, 1, 3, 0,
                 1, 2, 3, 4, 5, 0, 1, 2, 3, 4, 5, 6, 1, 2, 3, 4]
        all_y = [0, 1, 0, 1, 2, 0, 1, 2, 2, 3, 0, 0, 4, 3, 1, 5,
                 4, 3, 2, 1, 0, 6, 5, 4, 3, 2, 1, 0, 6, 5, 4, 3]
    else:  # 'bot'
        all_x = [6, 1, 3, 3, 2, 4, 1, 2, 4, 4, 5, 1, 4, 6, 2, 5,
                 6, 1, 6, 2, 2, 4, 3, 3, 5, 5, 6, 2, 5, 5, 3, 6]
        all_y = [6, 4, 4, 6, 6, 3, 1, 4, 4, 5, 6, 5, 2, 2, 5, 1,
                 4, 3, 5, 0, 3, 1, 1, 2, 4, 2, 1, 1, 5, 3, 3, 3]
    return all_x[:num_freq], all_y[:num_freq]


def _build_filter_1d(pos, freq, POS):
    result = math.cos(math.pi * freq * (pos + 0.5) / POS) / math.sqrt(POS)
    if freq == 0:
        return result
    return result * math.sqrt(2)


def get_dct_filter(tile_size_x, tile_size_y, mapper_x, mapper_y, channel):
    dct_filter = np.zeros((channel, tile_size_x, tile_size_y), dtype=np.float32)
    c_part = channel // len(mapper_x)
    for i, (u_x, v_y) in enumerate(zip(mapper_x, mapper_y)):
        bx = np.array([_build_filter_1d(tx, u_x, tile_size_x)
                       for tx in range(tile_size_x)], dtype=np.float32)
        by = np.array([_build_filter_1d(ty, v_y, tile_size_y)
                       for ty in range(tile_size_y)], dtype=np.float32)
        dct_filter[i * c_part:(i + 1) * c_part] = np.outer(bx, by)[None, :, :]
    return dct_filter


# ----------------------------------------------------------------------------
# Pallas kernel: fused (pool+DCT) spatial reduction + MLP gate + channel rescale
# ----------------------------------------------------------------------------
def _msa_kernel(xf_ref, dctw_ref, w1t_ref, w2t_ref, o_ref):
    # xf_ref  : (NB, C, HW)  full-resolution input, spatial flattened
    # dctw_ref: (C, HW)      DCT filter bank with the adaptive avg-pool folded in
    # w1t_ref : (C, Cr)      fc[0].weight, pre-transposed
    # w2t_ref : (Cr, C)      fc[2].weight, pre-transposed
    # o_ref   : (NB, C, HW)
    xf = xf_ref[...]
    dctw = dctw_ref[...]
    # DCT-weighted spatial reduction (== MultiSpectralDCTLayer on the pooled input),
    # accumulated in f32 regardless of the streaming dtype.
    y = jnp.sum(xf * dctw[None, :, :], axis=-1, dtype=jnp.float32)           # (NB, C)
    # Tiny 2-layer MLP gate: (NB, C) @ (C, Cr) -> ReLU -> (NB, Cr) @ (Cr, C) -> sigmoid
    h = jnp.maximum(jnp.dot(y, w1t_ref[...], preferred_element_type=jnp.float32), 0.0)
    s = jax.nn.sigmoid(jnp.dot(h, w2t_ref[...], preferred_element_type=jnp.float32))
    # Channel re-scale; single fused multiply + store of the streamed output tile.
    o_ref[...] = (xf * s[:, :, None].astype(xf.dtype)).astype(o_ref.dtype)


def _const_spec(shape):
    """Grid-invariant operand: single-buffered (double-buffering it is pure VMEM waste)."""
    try:
        return pl.BlockSpec(shape, lambda i: (0,) * len(shape), pipeline_mode=pl.Buffered(1))
    except Exception:
        # Older Pallas without pipeline_mode: fall back to the default (still correct).
        return pl.BlockSpec(shape, lambda i: (0,) * len(shape))


def multi_spectral_attention(x, dct_weight, w1, w2, dct_h, dct_w,
                             *, vmem_block_budget_bytes=None):
    n, c, h, w = x.shape
    cr = w1.shape[0]
    hw = h * w

    # ---- Fold adaptive_avg_pool2d into the DCT filter (both linear) ----------------
    # y[b,c] = sum_{i,j} pool(x)[b,c,i,j] * dct[c,i,j]
    #        = sum_{p,q} x[b,c,p,q] * dct[c, p//kh, q//kw] / (kh*kw)
    if (h, w) != (dct_h, dct_w):
        assert h % dct_h == 0 and w % dct_w == 0, "only divisible adaptive pooling supported"
        # TODO(synk): general (non-divisible) adaptive_avg_pool2d windows not implemented
        kh, kw = h // dct_h, w // dct_w
        dctw_full = jnp.repeat(jnp.repeat(dct_weight, kh, axis=1), kw, axis=2) / float(kh * kw)
    else:
        dctw_full = dct_weight
    # v6e/v7x VALUs are bf16-native: keep the filter/multiply in bf16 only when x is bf16
    # (f32 accumulation happens in the kernel either way). f32 inputs stay f32 (incl. v5e).
    compute_dtype = jnp.bfloat16 if x.dtype == jnp.bfloat16 else jnp.float32
    dctw_flat = dctw_full.reshape(c, hw).astype(compute_dtype)

    # Metadata-only reshapes: no extra HBM pass, no padding, no post-slice.
    xf_flat = x.reshape(n, c, hw)

    # ---- Per-generation VMEM budget / limit -----------------------------------------
    try:
        phys_vmem = int(pltpu.get_tpu_info().vmem_capacity_bytes)
    except Exception:
        phys_vmem = 64 * 2 ** 20                      # conservative (v7x per-TC VMEM)
    if vmem_block_budget_bytes is None:
        vmem_block_budget_bytes = 32 * 2 ** 20 if phys_vmem >= 100 * 2 ** 20 else 24 * 2 ** 20
    vmem_block_budget_bytes = min(vmem_block_budget_bytes, int(0.35 * phys_vmem))

    # ---- Batch-block sizing ----------------------------------------------------------
    # Per sample: in + out blocks (double-buffered) plus the f32 product/broadcast
    # intermediate of the reduction (previously unaccounted).
    itemsize = jnp.dtype(x.dtype).itemsize
    per_sample = 4 * c * hw * itemsize + 2 * c * hw * 4
    nb = max(1, int(vmem_block_budget_bytes // per_sample))
    nb = min(nb, n)
    # Aim for >= 4 grid steps (>= 2 per v7x TensorCore) so the BlockSpec pipeline overlaps
    # DMA with compute/writeback, but never shrink a block below ~1 MiB of streamed data.
    stream_bytes = 2 * c * hw * itemsize
    while nb > 1 and pl.cdiv(n, nb) < 4 and (nb // 2) * stream_bytes >= (1 << 20):
        nb //= 2
    grid = (pl.cdiv(n, nb),)          # ragged last block is fine: OOB rows are masked on store
    # TODO(synk): samples whose single (C, HW) block exceeds VMEM even at nb=1 need a second
    # 'arbitrary' HW-tile grid axis (two-pass: accumulate y per tile, then re-stream x * s).

    block_bytes = nb * per_sample
    const_bytes = c * hw * jnp.dtype(compute_dtype).itemsize + 2 * c * cr * 4
    vmem_limit = int(min(0.85 * phys_vmem, max(32 * 2 ** 20, 2 * (block_bytes + const_bytes))))

    # Pre-transpose the MLP weights in the wrapper (no in-kernel transpose).
    w1t = jnp.asarray(w1, jnp.float32).T              # (C, Cr)
    w2t = jnp.asarray(w2, jnp.float32).T              # (Cr, C)

    out = pl.pallas_call(
        _msa_kernel,
        out_shape=jax.ShapeDtypeStruct((n, c, hw), x.dtype),
        grid_spec=pltpu.PrefetchScalarGridSpec(
            num_scalar_prefetch=0,
            grid=grid,
            in_specs=[
                pl.BlockSpec((nb, c, hw), lambda i: (i, 0, 0)),   # x, streamed exactly once
                _const_spec((c, hw)),                             # pool-fused DCT filter
                _const_spec((c, cr)),                             # fc1 weight^T
                _const_spec((cr, c)),                             # fc2 weight^T
            ],
            out_specs=pl.BlockSpec((nb, c, hw), lambda i: (i, 0, 0)),
        ),
        compiler_params=pltpu.CompilerParams(
            dimension_semantics=("parallel",),
            vmem_limit_bytes=vmem_limit),
    )(xf_flat, dctw_flat, w1t, w2t)

    return out.reshape(n, c, h, w)


# ----------------------------------------------------------------------------
# Pure-JAX reference (for a sanity check)
# ----------------------------------------------------------------------------
def reference(x, dct_weight, w1, w2, dct_h, dct_w):
    n, c, h, w = x.shape
    if h != dct_h or w != dct_w:
        xp = x.reshape(n, c, dct_h, h // dct_h, dct_w, w // dct_w).mean(axis=(3, 5))
    else:
        xp = x
    y = jnp.sum(xp * dct_weight[None], axis=(2, 3))            # (n, c)  <- MultiSpectralDCTLayer
    hdd = jnp.maximum(y @ w1.T, 0.0)                           # (n, cr)
    s = jax.nn.sigmoid(hdd @ w2.T)                             # (n, c)
    return x * s[:, :, None, None]


if __name__ == "__main__":
    # Module config (small): channel=32, dct_h=dct_w=8, reduction=16, top16 freqs
    channel = 32
    dct_h = dct_w = 8
    reduction = 16
    freq_sel_method = 'top16'

    mapper_x, mapper_y = get_freq_indices(freq_sel_method)
    mapper_x = [mx * (dct_h // 7) for mx in mapper_x]
    mapper_y = [my * (dct_w // 7) for my in mapper_y]
    dct_weight = jnp.asarray(
        get_dct_filter(dct_h, dct_w, mapper_x, mapper_y, channel))      # (C, dct_h, dct_w)

    # Deterministic fc weights (shapes match nn.Linear: (out_features, in_features))
    key = jax.random.PRNGKey(0)
    k_x, k_w1, k_w2 = jax.random.split(key, 3)
    cr = channel // reduction
    w1 = jax.random.normal(k_w1, (cr, channel), dtype=jnp.float32) * 0.1
    w2 = jax.random.normal(k_w2, (channel, cr), dtype=jnp.float32) * 0.1

    # Input: N=2, C=32, H=W=16 (exercises the fused adaptive avg pool 16 -> 8)
    x = jax.random.normal(k_x, (2, channel, 16, 16), dtype=jnp.float32)

    out = multi_spectral_attention(x, dct_weight, w1, w2, dct_h, dct_w)
    out = jax.block_until_ready(out)

    ref = reference(x, dct_weight, w1, w2, dct_h, dct_w)
    np.testing.assert_allclose(np.asarray(out), np.asarray(ref), rtol=1e-4, atol=1e-5)

    print("KERNEL_OK")
</pallas_src>

<mosaic_0001>
module attributes {stable_mosaic.version = 11 : i64} {
  func.func @_msa_kernel(%arg0: i32, %arg1: memref<2x32x256xf32, #tpu.memory_space<vmem>>, %arg2: memref<32x256xf32, #tpu.memory_space<vmem>>, %arg3: memref<32x2xf32, #tpu.memory_space<vmem>>, %arg4: memref<2x32xf32, #tpu.memory_space<vmem>>, %arg5: memref<2x32x256xf32, #tpu.memory_space<vmem>>) attributes {dimension_semantics = [#tpu.dimension_semantics<parallel>], iteration_bounds = array<i64: 1>, scalar_prefetch = 0 : i64, scratch_operands = 0 : i64, tpu.core_type = #tpu.core_type<tc>, window_params = [{transform_indices = @transform_0, window_bounds = array<i64: 2, 32, 256>}, {pipeline_mode = #tpu.pipeline_mode<synchronous>, transform_indices = @transform_1, window_bounds = array<i64: 32, 256>}, {pipeline_mode = #tpu.pipeline_mode<synchronous>, transform_indices = @transform_2, window_bounds = array<i64: 32, 2>}, {pipeline_mode = #tpu.pipeline_mode<synchronous>, transform_indices = @transform_3, window_bounds = array<i64: 2, 32>}, {transform_indices = @transform_4, window_bounds = array<i64: 2, 32, 256>}]} {
    %c0 = arith.constant 0 : index
    %c0_0 = arith.constant 0 : index
    %c0_1 = arith.constant 0 : index
    %0 = vector.load %arg1[%c0, %c0_0, %c0_1] : memref<2x32x256xf32, #tpu.memory_space<vmem>>, vector<2x32x256xf32>
    %c0_2 = arith.constant 0 : index
    %c0_3 = arith.constant 0 : index
    %1 = vector.load %arg2[%c0_2, %c0_3] : memref<32x256xf32, #tpu.memory_space<vmem>>, vector<32x256xf32>
    %2 = vector.shape_cast %1 : vector<32x256xf32> to vector<1x32x256xf32>
    %3 = vector.broadcast %2 : vector<1x32x256xf32> to vector<2x32x256xf32>
    %4 = arith.mulf %0, %3 : vector<2x32x256xf32>
    %cst = arith.constant dense<0.000000e+00> : vector<2x32xf32>
    %5 = vector.multi_reduction <add>, %4, %cst [2] : vector<2x32x256xf32> to vector<2x32xf32>
    %c0_4 = arith.constant 0 : index
    %c0_5 = arith.constant 0 : index
    %6 = vector.load %arg3[%c0_4, %c0_5] : memref<32x2xf32, #tpu.memory_space<vmem>>, vector<32x2xf32>
    %cst_6 = arith.constant dense<0.000000e+00> : vector<2x2xf32>
    %7 = tpu.matmul %5, %6, %cst_6 {dimension_numbers = #tpu.dot_dimension_numbers<[1], [0], [0], [1], [0, 0, 1, 1], [], []>} : vector<2x32xf32>, vector<32x2xf32>, vector<2x2xf32> -> vector<2x2xf32>
    %cst_7 = arith.constant 0.000000e+00 : f32
    %8 = vector.broadcast %cst_7 : f32 to vector<2x2xf32>
    %9 = arith.maximumf %7, %8 : vector<2x2xf32>
    %c0_8 = arith.constant 0 : index
    %c0_9 = arith.constant 0 : index
    %10 = vector.load %arg4[%c0_8, %c0_9] : memref<2x32xf32, #tpu.memory_space<vmem>>, vector<2x32xf32>
    %cst_10 = arith.constant dense<0.000000e+00> : vector<2x32xf32>
    %11 = tpu.matmul %9, %10, %cst_10 {dimension_numbers = #tpu.dot_dimension_numbers<[1], [0], [0], [1], [0, 0, 1, 1], [], []>} : vector<2x2xf32>, vector<2x32xf32>, vector<2x32xf32> -> vector<2x32xf32>
    %12 = arith.negf %11 : vector<2x32xf32>
    %13 = math.exp %12 : vector<2x32xf32>
    %cst_11 = arith.constant 1.000000e+00 : f32
    %14 = vector.broadcast %cst_11 : f32 to vector<2x32xf32>
    %15 = arith.addf %14, %13 : vector<2x32xf32>
    %16 = arith.divf %14, %15 : vector<2x32xf32>
    %17 = vector.shape_cast %16 : vector<2x32xf32> to vector<2x32x1xf32>
    %18 = vector.broadcast %17 : vector<2x32x1xf32> to vector<2x32x256xf32>
    %19 = arith.mulf %0, %18 : vector<2x32x256xf32>
    %c0_12 = arith.constant 0 : index
    %c0_13 = arith.constant 0 : index
    %c0_14 = arith.constant 0 : index
    %20 = vector.load %arg5[%c0_12, %c0_13, %c0_14] : memref<2x32x256xf32, #tpu.memory_space<vmem>>, vector<2x32x256xf32>
    tpu.vector_store %arg5[%c0_12, %c0_13, %c0_14], %19 {strides = array<i32>} : memref<2x32x256xf32, #tpu.memory_space<vmem>>, vector<2x32x256xf32>,
    return
  }
  func.func @transform_0(%arg0: i32) -> (i32, i32, i32) {
    %c0_i32 = arith.constant 0 : i32
    %c0_i32_0 = arith.constant 0 : i32
    %c0_i32_1 = arith.constant 0 : i32
    return %arg0, %c0_i32, %c0_i32_0 : i32, i32, i32
  }
  func.func @transform_1(%arg0: i32) -> (i32, i32) {
    %c0_i32 = arith.constant 0 : i32
    %c0_i32_0 = arith.constant 0 : i32
    %c0_i32_1 = arith.constant 0 : i32
    return %c0_i32, %c0_i32_0 : i32, i32
  }
  func.func @transform_2(%arg0: i32) -> (i32, i32) {
    %c0_i32 = arith.constant 0 : i32
    %c0_i32_0 = arith.constant 0 : i32
    %c0_i32_1 = arith.constant 0 : i32
    return %c0_i32, %c0_i32_0 : i32, i32
  }
  func.func @transform_3(%arg0: i32) -> (i32, i32) {
    %c0_i32 = arith.constant 0 : i32
    %c0_i32_0 = arith.constant 0 : i32
    %c0_i32_1 = arith.constant 0 : i32
    return %c0_i32, %c0_i32_0 : i32, i32
  }
  func.func @transform_4(%arg0: i32) -> (i32, i32, i32) {
    %c0_i32 = arith.constant 0 : i32
    %c0_i32_0 = arith.constant 0 : i32
    %c0_i32_1 = arith.constant 0 : i32
    return %arg0, %c0_i32, %c0_i32_0 : i32, i32, i32
  }
}

</mosaic_0001>

<bundles_post_ra>
// kernel: tpu_custom_call.1
= control target key start
LH: loop header
LB: loop body
LE: loop exit
PB: predicated region body
PF: predicated region fallthrough
CT: control target
= control target key end

     0   :  { %9 = vsyncpa [#allocation3], 0  ;;  %s551_s0 = inlined_call_operand.hbm [shape: f32[2,32,256], index: 0, kind: input, shape index: {}]   ;;  %s552_s1 = inlined_call_operand.hbm [shape: f32[32,256], index: 1, kind: input, shape index: {}]   ;;  %s553_s2 = inlined_call_operand.vmem [shape: f32[32,2], index: 2, kind: input, shape index: {}]   ;;  %s554_s3 = inlined_call_operand.vmem [shape: f32[2,32], index: 3, kind: input, shape index: {}]   ;;  %s555_s4 = inlined_call_operand.hbm [shape: f32[2,32,256], index: 4, kind: output, shape index: {}]  }
   0x1   :  { %10 = vsyncpa [#allocation6], 0 }
   0x2   :  { %11 = vsyncpa [#allocation4], 0  ;;  %s16_s17 = sshll.u32 %s551_s0, 4  ;;  %s424_s18 = smov [#allocation2]   ;;  %s17_s17 = int_to_ptr.hbm [resolvable:$true] %s16_s17 }
   0x3   :  { %s18_s19 = sshll.u32 %s424_s18, 4  ;;  %s29_s22 = sshll.u32 %s552_s1, 4  ;;  %s19_s19 = int_to_ptr.vmem [resolvable:$true] %s18_s19  ;;  %s30_s22 = int_to_ptr.hbm [resolvable:$true] %s29_s22 }
   0x4   :  { %s425_s23 = smov 256   ;;  %s426_s24 = smov 16  }
   0x5   :  { %24 = dma.hbm_to_vmem [thread:$0]  %s17_s17, 2048, %s19_s19, [#allocation3], %s425_s23, %s425_s23, %s426_s24  }
   0x6   :  { %s427_s25 = smov [#allocation5]  }
   0x7   :  { %s31_s26 = sshll.u32 %s427_s25, 4  ;;  %s32_s26 = int_to_ptr.vmem [resolvable:$true] %s31_s26 }
   0x8   :  { %37 = dma.hbm_to_vmem [thread:$0]  %s30_s22, 1024, %s32_s26, [#allocation6], %s425_s23, %s425_s23, %s426_s24  }
   0x9   :  { %418 = dma.done.wait [#allocation3], 2048  }
   0xa   :  { %419 = vsyncadd [#allocation3], 4294965248 }
   0xb   :  { %420 = dma.done.wait [#allocation6], 1024  }
   0xc   :  { %421 = vsyncadd [#allocation6], 4294966272  ;;  %v466_v0 = vld [vmem:[#allocation2 + $0x40] sm:$0xff]  ;;  %v468_v1 = vld [vmem:[#allocation2 + $0x48] sm:$0xff]  ;;  %v126_v54 = vlaneseq  ;;  %vm131_vm0 = vcmask 130112   ;;  %vm135_vm1 = vcmask 195712  }
   0xd   :  { %v66_v2 = vld [vmem:[#allocation5] sm:$0xff]  ;;  %v67_v3 = vld [vmem:[#allocation5 + $0x8] sm:$0xff]  ;;  %v483_v15 = vld [vmem:[#allocation2 + $0x50] sm:$0xff]  ;;  %vm139_vm2 = vcmask 261312   ;;  %vm148_vm3 = vcmask 1041409   ;;  %vm150_vm4 = vcmask 261120  }
   0xe   :  { %v82_v4 = vmul.f32 %v66_v2, %v466_v0  ;;  %v471_v5 = vld [vmem:[#allocation2] sm:$0xff]  ;;  %v473_v6 = vld [vmem:[#allocation2 + $0x8] sm:$0xff]  ;;  %v83_v7 = vmul.f32 %v67_v3, %v468_v1  ;;  %v485_v16 = vld [vmem:[#allocation2 + $0x58] sm:$0xff]  ;;  %v127_v56 = vand.u32 127, %v126_v54  ;;  %vm179_vm5 = vcmask 1041408   ;;  %s310_s11 = sshll.u32 %s555_s4, 4  ;;  %s311_s11 = int_to_ptr.hbm [resolvable:$true] %s310_s11 }
   0xf   :  { %v74_v8 = vmul.f32 %v66_v2, %v471_v5  ;;  %v75_v9 = vmul.f32 %v67_v3, %v473_v6  ;;  %v478_v10 = vld [vmem:[#allocation2 + $0x20] sm:$0xff]  ;;  %v480_v11 = vld [vmem:[#allocation2 + $0x28] sm:$0xff]  ;;  %v68_v20 = vld [vmem:[#allocation5 + $0x10] sm:$0xff]  ;;  %vm175_vm6 = vcmask 15360  }
  0x10   :  { %v70_v12 = vld [vmem:[#allocation5 + $0x20] sm:$0xff]  ;;  %v71_v13 = vld [vmem:[#allocation5 + $0x28] sm:$0xff]  ;;  %v102_v17 = vadd.f32 %v83_v7, %v82_v4  ;;  %v69_v21 = vld [vmem:[#allocation5 + $0x18] sm:$0xff]  ;;  %v84_v23 = vmul.f32 %v68_v20, %v483_v15  ;;  %v129_v57 = vadd.s32 4294967288, %v127_v56  ;;  %v133_v63 = vadd.s32 4294967280, %v127_v56 }
  0x11   :  { %v78_v14 = vmul.f32 %v70_v12, %v478_v10  ;;  %v90_v18 = vadd.f32 %v75_v9, %v74_v8  ;;  %v79_v19 = vmul.f32 %v71_v13, %v480_v11  ;;  %v488_v22 = vld [vmem:[#allocation2 + $0x10] sm:$0xff]  ;;  %v85_v24 = vmul.f32 %v69_v21, %v485_v16  ;;  %v492_v25 = vld [vmem:[#allocation2 + $0x18] sm:$0xff]  ;;  %v494_v26 = vld [vmem:[#allocation2 + $0x60] sm:$0xff] }
  0x12   :  { %v496_v27 = vld [vmem:[#allocation2 + $0x68] sm:$0xff]  ;;  %103 = vadd.xlane.f32.xlu1 %v102_v17  ;;  %v76_v29 = vmul.f32 %v68_v20, %v488_v22  ;;  %v77_v30 = vmul.f32 %v69_v21, %v492_v25  ;;  %v86_v31 = vmul.f32 %v70_v12, %v494_v26  ;;  %v502_v35 = vld [vmem:[#allocation2 + $0x70] sm:$0xff]  ;;  %v504_v36 = vld [vmem:[#allocation2 + $0x78] sm:$0xff]  ;;  %v137_v4 = vadd.s32 4294967272, %v127_v56 }
  0x13   :  { %91 = vadd.xlane.f32.xlu0 %v90_v18  ;;  %v96_v28 = vadd.f32 %v79_v19, %v78_v14  ;;  %v87_v32 = vmul.f32 %v71_v13, %v496_v27  ;;  %v105_v33 = vadd.f32 %v85_v24, %v84_v23  ;;  %v72_v37 = vld [vmem:[#allocation5 + $0x30] sm:$0xff]  ;;  %v73_v38 = vld [vmem:[#allocation5 + $0x38] sm:$0xff]  ;;  %v115_v50 = vld [vmem:[%s553_s2 + $0x8] sm:$0xff] }
  0x14   :  { %v93_v34 = vadd.f32 %v77_v30, %v76_v29  ;;  %v506_v39 = vld [vmem:[#allocation2 + $0x30] sm:$0xff]  ;;  %v508_v40 = vld [vmem:[#allocation2 + $0x38] sm:$0xff]  ;;  %v88_v42 = vmul.f32 %v72_v37, %v502_v35  ;;  %v89_v43 = vmul.f32 %v73_v38, %v504_v36  ;;  %v114_v51 = vld [vmem:[%s553_s2] sm:$0xff] }
  0x15   :  { %97 = vadd.xlane.f32.xlu2 %v96_v28  ;;  %v108_v41 = vadd.f32 %v87_v32, %v86_v31  ;;  %v80_v44 = vmul.f32 %v72_v37, %v506_v39  ;;  %v81_v45 = vmul.f32 %v73_v38, %v508_v40  ;;  %v117_v48 = vld [vmem:[%s553_s2 + $0x18] sm:$0xff]  ;;  %v116_v49 = vld [vmem:[%s553_s2 + $0x10] sm:$0xff]  ;;  %v174_v28 = vld [vmem:[%s554_s3] sm:$0x3]  ;;  %v224_v31 = vshrl.u32 %v126_v54, 7  ;;  %s428_s3 = smov [#allocation7]  }
  0x16   :  { %v111_v46 = vadd.f32 %v89_v43, %v88_v42  ;;  %165 = vmatpush.msra.mxu0 %v117_v48  ;;  %325 = vmatpush.msk.msra.mxu1 %vm179_vm5, %v174_v28  ;;  %s308_s8 = sshll.u32 %s428_s3, 4  ;;  %s309_s8 = int_to_ptr.vmem [resolvable:$true] %s308_s8 }
  0x17   :  { %v99_v47 = vadd.f32 %v81_v45, %v80_v44  ;;  %333 = vset.pattern.permute.xlu2 %v224_v31  ;;  %v237_v32 = vadd.s32 16, %v224_v31 }
  0x18   :  { %166 = vmatpush.msra.mxu0 %v116_v49 }
  0x19   :  { %335 = vset.pattern.permute.xlu1 %v237_v32 }
  0x1a   :  { %106 = vadd.xlane.f32.xlu1 %v105_v33  ;;  %167 = vmatpush.msra.mxu0 %v115_v50  ;;  %v231_v33 = vadd.s32 8, %v224_v31 }
  0x1b   :  { %94 = vadd.xlane.f32.xlu0 %v93_v34 }
  0x1c   :  { %168 = vmatpush.msra.mxu0 %v114_v51  ;;  %334 = vset.pattern.permute.xlu0 %v231_v33 }
  0x1d   :  { %109 = vadd.xlane.f32.xlu2 %v108_v41 }
  0x22   :  { %112 = vadd.xlane.f32.xlu1 %v111_v46 }
  0x23   :  { %100 = vadd.xlane.f32.xlu0 %v99_v47 }
  0x85   :  { %v104_v52 = vpop.xlane.xlu1 %103 }
  0x86   :  { %v92_v53 = vpop.xlane.xlu0 %91  ;;  %v141_v2 = vperm.slane %v104_v52, %v127_v56 }
  0x87   :  { %v128_v3 = vperm.slane %v92_v53, %v127_v56  ;;  %v243_v53 = vadd.s32 24, %v224_v31 }
  0x88   :  { %v98_v55 = vpop.xlane.xlu2 %97 }
  0x89   :  { %v134_v12 = vperm.slane %v98_v55, %v133_v63 }
  0x8d   :  { %v107_v58 = vpop.xlane.xlu1 %106 }
  0x8e   :  { %v95_v59 = vpop.xlane.xlu0 %94  ;;  %v142_v60 = vperm.slane %v107_v58, %v129_v57 }
  0x8f   :  { %v130_v61 = vperm.slane %v95_v59, %v129_v57 }
  0x90   :  { %v110_v62 = vpop.xlane.xlu2 %109  ;;  %v143_v8 = vsel %vm131_vm0, %v142_v60, %v141_v2 }
  0x91   :  { %v144_v7 = vperm.slane %v110_v62, %v133_v63  ;;  %v132_v9 = vsel %vm131_vm0, %v130_v61, %v128_v3 }
  0x92   :  { %v136_v20 = vsel %vm135_vm1, %v134_v12, %v132_v9 }
  0x93   :  { %v145_v19 = vsel %vm135_vm1, %v144_v7, %v143_v8 }
  0x95   :  { %v113_v13 = vpop.xlane.xlu1 %112 }
  0x96   :  { %v101_v14 = vpop.xlane.xlu0 %100  ;;  %v146_v17 = vperm.slane %v113_v13, %v137_v4 }
  0x97   :  { %v138_v18 = vperm.slane %v101_v14, %v137_v4 }
  0x98   :  { %v147_v23 = vsel %vm139_vm2, %v146_v17, %v145_v19 }
  0x99   :  { %v140_v21 = vsel %vm139_vm2, %v138_v18, %v136_v20 }
  0x9a   :  { %v149_v24 = vsel %vm148_vm3, %v147_v23, %v140_v21 }
  0x9b   :  { %324 = vmatmul.msk.f32.vlgmr.msra.gmra.mxu0 %vm150_vm4, %v149_v24 }
 0x118   :  { %v170_v29 = vpop.f32.mrf.mxu0 }
 0x119   :  { %v173_v30 = vmax.f32 %v170_v29, 0.0 }
 0x11b   :  { %326 = vmatmul.msk.f32.vlgmr.msra.gmra.mxu1 %vm175_vm6, %v173_v30 }
 0x198   :  { %v200_v34 = vpop.f32.mrf.mxu1 }
 0x199   :  { %v327_v37 = vmul.f32 -1.442695, %v200_v34 }
 0x19b   :  { %342 = vpow2.f32 %v327_v37 }
 0x1a1   :  { %v343_v38 = vpop.eup %342 }
 0x1a2   :  { %v206_v41 = vadd.f32 1.0, %v343_v38 }
 0x1a4   :  { %344 = vrcp.f32 %v206_v41  ;;  %v218_v45 = vand.u32 2147483648, %v206_v41  ;;  %v216_v47 = vand.u32 2147483647, %v206_v41  ;;  %vm212_vm8 = vweird.f32 %v206_v41 }
 0x1a6   :  { %v219_v49 = vor.u32 1.1754944e-38, %v218_v45  ;;  %vm217_vm10 = vcmp.eq.f32.partialorder %v216_v47, 8.507059e+37 }
 0x1aa   :  { %v345_v42 = vpop.eup %344 }
 0x1ab   :  { %v208_v43 = vmul.f32 %v345_v42, %v206_v41  ;;  %vm213_vm7 = vweird.f32 %v345_v42 }
 0x1ac   :  { %vm214_vm9 = vmor %vm212_vm8, %vm213_vm7 }
 0x1ad   :  { %v209_v44 = vsub.f32 1.0, %v208_v43 }
 0x1af   :  { %v210_v46 = vmul.f32 %v345_v42, %v209_v44 }
 0x1b1   :  { %v211_v48 = vadd.f32 %v345_v42, %v210_v46 }
 0x1b3   :  { %v215_v50 = vsel %vm214_vm9, %v345_v42, %v211_v48 }
 0x1b4   :  { %v220_v51 = vsel %vm217_vm10, %v219_v49, %v215_v50 }
 0x1b5   :  { %v222_v52 = vperm.slane %v220_v51, 0  ;;  %v247_v54 = vperm.slane %v220_v51, 1 }
 0x1b7   :  { %239 = vperm.xlu1 %335, %v222_v52   ;;  %233 = vperm.xlu0 %334, %v222_v52  }
 0x1b8   :  { %227 = vperm.xlu2 %333, %v222_v52  }
 0x1bf   :  { %338 = vset.pattern.permute.xlu1 %v231_v33  ;;  %341 = vset.pattern.permute.xlu0 %v243_v53 }
 0x1c0   :  { %336 = vset.pattern.permute.xlu2 %v243_v53 }
 0x1c7   :  { %258 = vperm.xlu1 %338, %v247_v54  }
 0x1c8   :  { %245 = vperm.xlu2 %336, %v222_v52  }
 0x1cf   :  { %340 = vset.pattern.permute.xlu1 %v243_v53 }
 0x1d0   :  { %337 = vset.pattern.permute.xlu2 %v224_v31 }
 0x1d7   :  { %270 = vperm.xlu1 %340, %v247_v54  }
 0x1d8   :  { %252 = vperm.xlu2 %337, %v247_v54  }
 0x1e0   :  { %339 = vset.pattern.permute.xlu2 %v237_v32 }
 0x1e8   :  { %264 = vperm.xlu2 %339, %v247_v54  }
 0x212   :  { %v228_v55 = vpop.permute.xlu2 %227 }
 0x213   :  { %v272_v56 = vmul.f32 %v228_v55, %v471_v5  ;;  %v273_v57 = vmul.f32 %v228_v55, %v473_v6 }
 0x215   :  { %288 = vst [vmem:[#allocation7] sm:$0xff] %v272_v56 }
 0x216   :  { %289 = vst [vmem:[#allocation7 + $0x8] sm:$0xff] %v273_v57 }
 0x222   :  { %v246_v58 = vpop.permute.xlu2 %245 }
 0x223   :  { %v278_v59 = vmul.f32 %v246_v58, %v506_v39  ;;  %v279_v60 = vmul.f32 %v246_v58, %v508_v40 }
 0x225   :  { %294 = vst [vmem:[#allocation7 + $0x30] sm:$0xff] %v278_v59 }
 0x226   :  { %295 = vst [vmem:[#allocation7 + $0x38] sm:$0xff] %v279_v60 }
 0x229   :  { %v240_v61 = vpop.permute.xlu1 %239  ;;  %v234_v62 = vpop.permute.xlu0 %233 }
 0x22a   :  { %v276_v63 = vmul.f32 %v240_v61, %v478_v10  ;;  %v277_v2 = vmul.f32 %v240_v61, %v480_v11  ;;  %v274_v3 = vmul.f32 %v234_v62, %v488_v22  ;;  %v275_v5 = vmul.f32 %v234_v62, %v492_v25 }
 0x22c   :  { %292 = vst [vmem:[#allocation7 + $0x20] sm:$0xff] %v276_v63 }
 0x22d   :  { %293 = vst [vmem:[#allocation7 + $0x28] sm:$0xff] %v277_v2 }
 0x22e   :  { %290 = vst [vmem:[#allocation7 + $0x10] sm:$0xff] %v274_v3 }
 0x22f   :  { %291 = vst [vmem:[#allocation7 + $0x18] sm:$0xff] %v275_v5 }
 0x232   :  { %v253_v6 = vpop.permute.xlu2 %252 }
 0x233   :  { %v280_v39 = vmul.f32 %v253_v6, %v466_v0  ;;  %v281_v40 = vmul.f32 %v253_v6, %v468_v1 }
 0x235   :  { %296 = vst [vmem:[#allocation7 + $0x40] sm:$0xff] %v280_v39 }
 0x236   :  { %297 = vst [vmem:[#allocation7 + $0x48] sm:$0xff] %v281_v40 }
 0x239   :  { %v259_v4 = vpop.permute.xlu1 %258 }
 0x23a   :  { %v282_v10 = vmul.f32 %v259_v4, %v483_v15  ;;  %v283_v11 = vmul.f32 %v259_v4, %v485_v16 }
 0x23c   :  { %298 = vst [vmem:[#allocation7 + $0x50] sm:$0xff] %v282_v10 }
 0x23d   :  { %299 = vst [vmem:[#allocation7 + $0x58] sm:$0xff] %v283_v11 }
 0x242   :  { %v265_v22 = vpop.permute.xlu2 %264 }
 0x243   :  { %v284_v25 = vmul.f32 %v265_v22, %v494_v26  ;;  %v285_v7 = vmul.f32 %v265_v22, %v496_v27 }
 0x245   :  { %300 = vst [vmem:[#allocation7 + $0x60] sm:$0xff] %v284_v25 }
 0x246   :  { %301 = vst [vmem:[#allocation7 + $0x68] sm:$0xff] %v285_v7 }
 0x249   :  { %v271_v0 = vpop.permute.xlu1 %270 }
 0x24a   :  { %v286_v1 = vmul.f32 %v271_v0, %v502_v35  ;;  %v287_v15 = vmul.f32 %v271_v0, %v504_v36 }
 0x24c   :  { %302 = vst [vmem:[#allocation7 + $0x70] sm:$0xff] %v286_v1 }
 0x24d   :  { %303 = vst [vmem:[#allocation7 + $0x78] sm:$0xff] %v287_v15 }
 0x24e   :  { %316 = dma.vmem_to_hbm [thread:$0]  %s309_s8, 2048, %s311_s11, [#allocation4], %s425_s23, %s425_s23, %s426_s24  }
 0x24f   :  { %422 = dma.done.wait [#allocation4], 2048  }
 0x250   :  { %423 = vsyncadd [#allocation4], 4294965248 }
 0x251   :  { %321 = vsyncpa [#allocation3], 1 }
 0x252   :  { %322 = vsyncpa [#allocation6], 1 }
 0x253   :  { %323 = vsyncpa [#allocation4], 1 }

</bundles_post_ra>
